<compile_context>
chip_gen: v7x
topology: tpu7x:2x2x1
jax: 0.10.0
libtpu: 0.0.40
codegen_flags: <defaults>
</compile_context>

<pallas_src>
import functools
import math

import jax
import jax.numpy as jnp
from jax.experimental import pallas as pl
from jax.experimental.pallas import tpu as pltpu

EPS = 1e-12  # BERT LayerNorm eps


# ----------------------------- in-kernel helpers -----------------------------

def _ln_f32(x32, gamma, beta):
    # LayerNorm over last dim, all statistics in f32. x32: [S, H], gamma/beta: [1, H]
    mu = jnp.mean(x32, axis=-1, keepdims=True)
    var = jnp.mean((x32 - mu) ** 2, axis=-1, keepdims=True)
    return (x32 - mu) * jax.lax.rsqrt(var + EPS) * gamma + beta


def _gelu(x):
    # TODO(synk): HF BERT uses exact erf-GELU; tanh approximation used here.
    c = 0.7978845608028654  # sqrt(2/pi)
    return 0.5 * x * (1.0 + jnp.tanh(c * (x + 0.044715 * x * x * x)))


# ------------------------------- Pallas kernels ------------------------------

def embed_ln_kernel(word_ref, pos_ref, ttcol_ref, type_tab_ref, g_ref, b_ref,
                    o_ref):
    # Fused embedding-sum + LayerNorm. Token-type embedding is selected in-kernel
    # from the (2, H) table (token types are 0/1), so no [B,S,H] gather tensor
    # has to round-trip through HBM.
    x = word_ref[0].astype(jnp.float32) + pos_ref[...].astype(jnp.float32)
    tab = type_tab_ref[...].astype(jnp.float32)        # [2, H]
    e0 = tab[0:1, :]                                   # [1, H]
    e1 = tab[1:2, :]                                   # [1, H]
    tt = ttcol_ref[0]                                  # [S, 1] f32 in {0, 1}
    x = x + e0 + tt * (e1 - e0)
    o_ref[0] = _ln_f32(x, g_ref[...], b_ref[...]).astype(o_ref.dtype)


def layer_kernel(xq_ref, xf_ref, amask_ref,
                 wqh_ref, bqh_ref, wkh_ref, bkh_ref, wvh_ref, bvh_ref,
                 woh_ref, bo_ref, ln1g_ref, ln1b_ref,
                 w1_ref, b1_ref, w2_ref, b2_ref, ln2g_ref, ln2b_ref,
                 o_ref, acc_ref, *, num_heads):
    # One fused encoder layer (MHA + Add&LN + FFN + Add&LN) for one query tile.
    dh = wqh_ref.shape[-1]
    scale = 1.0 / math.sqrt(dh)

    acc_ref[...] = jnp.zeros_like(acc_ref)             # [tq, H] f32 accumulator

    # Per-head attention: head-major weight slices -> plain 2D matmuls; no
    # reshape/transpose relayouts, and only one [tq, S] score tile live at once.
    @pl.loop(0, num_heads)
    def _(h):
        xq = xq_ref[0]                                  # [tq, H] bf16
        xf = xf_ref[0]                                  # [S,  H] bf16
        q = jnp.dot(xq, wqh_ref[h],
                    preferred_element_type=jnp.float32) + bqh_ref[h]   # [tq, dh]
        k = jnp.dot(xf, wkh_ref[h],
                    preferred_element_type=jnp.float32) + bkh_ref[h]   # [S,  dh]
        v = jnp.dot(xf, wvh_ref[h],
                    preferred_element_type=jnp.float32) + bvh_ref[h]   # [S,  dh]

        # scores: q @ k^T (contraction over dh), f32
        s = jnp.einsum('qd,kd->qk', q.astype(jnp.bfloat16),
                       k.astype(jnp.bfloat16),
                       preferred_element_type=jnp.float32)             # [tq, S]
        s = s * scale + amask_ref[0]                    # additive key mask [1, S]
        s = s - jnp.max(s, axis=-1, keepdims=True)
        p = jnp.exp(s)
        p = p * pl.reciprocal(jnp.sum(p, axis=-1, keepdims=True), approx=True)

        ctx = jnp.dot(p.astype(jnp.bfloat16), v.astype(jnp.bfloat16),
                      preferred_element_type=jnp.float32)              # [tq, dh]
        # per-head output projection, accumulated over heads in f32
        acc_ref[...] += jnp.dot(ctx.astype(jnp.bfloat16), woh_ref[h],
                                preferred_element_type=jnp.float32)

    xq32 = xq_ref[0].astype(jnp.float32)
    attn = acc_ref[...] + bo_ref[...]
    h1 = _ln_f32(xq32 + attn, ln1g_ref[...], ln1b_ref[...])            # [tq, H]

    # FFN (GELU) + Add & LN, fused in the same kernel (no HBM round trip).
    inter = jnp.dot(h1.astype(jnp.bfloat16), w1_ref[...],
                    preferred_element_type=jnp.float32) + b1_ref[...]
    inter = _gelu(inter).astype(jnp.bfloat16)
    ffn = jnp.dot(inter, w2_ref[...],
                  preferred_element_type=jnp.float32) + b2_ref[...]
    o_ref[0] = _ln_f32(h1 + ffn, ln2g_ref[...], ln2b_ref[...]).astype(o_ref.dtype)


def classifier_kernel(cls_ref, w_ref, b_ref, o_ref):
    # Output width is padded to a multiple of 128 lanes (dense vst), sliced outside.
    o_ref[...] = jnp.dot(cls_ref[...], w_ref[...],
                         preferred_element_type=jnp.float32) + b_ref[...]


# ----------------------------- VMEM budgeting --------------------------------

def _vmem_cap_bytes():
    # Physical VMEM differs per generation (v5e/v6e: 128 MiB, v7x: 64 MiB).
    # Leave ~25% headroom for compiler scratch: ~48 MiB on v7x, ~96 MiB on v5e/v6e.
    default_cap = 64 * 1024 * 1024
    try:
        info = pltpu.get_tpu_info()
        cap = int(getattr(info, "vmem_capacity_bytes", default_cap))
    except Exception:
        cap = default_cap
    return (cap * 3) // 4


def _vmem_limit(estimate_bytes):
    return int(min(max(int(estimate_bytes), 32 * 1024 * 1024), _vmem_cap_bytes()))


def _layer_vmem_estimate(S, tq, H, I, nH, dh):
    bf, f4 = 2, 4
    # DMA-resident blocks (assume double-buffered by the pipeline).
    blocks = (tq * H * bf + S * H * bf + S * f4              # x tile, full x, mask
              + 4 * H * H * bf + 3 * nH * dh * f4 + H * f4   # QKV/O weights+biases
              + 2 * H * I * bf + I * f4 + H * f4             # FFN weights+biases
              + 4 * H * f4                                   # LayerNorm params
              + tq * H * bf)                                 # output tile
    # In-kernel intermediates (single-buffered) + scratch accumulator.
    inter = (tq * H * f4                                     # acc scratch
             + (tq + 2 * S) * dh * (f4 + bf)                 # q/k/v (one head live)
             + 2 * tq * S * f4                               # scores + probs
             + tq * dh * f4                                  # ctx
             + 3 * tq * H * f4                               # attn, h1, ffn
             + tq * I * (f4 + bf))                           # GELU intermediate
    return 2 * blocks + (3 * inter) // 2


def _embed_vmem_estimate(S, H):
    bf, f4 = 2, 4
    blocks = 3 * S * H * bf + S * f4 + 2 * H * bf + 2 * H * f4
    inter = 4 * S * H * f4
    return 2 * blocks + inter


# ------------------------------ kernel wrappers -------------------------------

def _choose_q_tile(S):
    # Query-tile the sequence so the pipeline / megacore get >B grid steps and
    # the per-step score tile is capped at [tq, S]. K/V are recomputed per tile
    # (cheap relative to the round trip it replaces); keep tq >= 256 when S allows.
    if S > 256 and S % 256 == 0:
        return 256
    return S


def embed_layernorm(word_g, pos_e, tt_col, type_tab, gamma, beta):
    B, S, H = word_g.shape
    return pl.pallas_call(
        embed_ln_kernel,
        out_shape=jax.ShapeDtypeStruct((B, S, H), jnp.bfloat16),
        grid=(B,),
        in_specs=[pl.BlockSpec((1, S, H), lambda b: (b, 0, 0)),   # word gather
                  pl.BlockSpec((S, H), lambda b: (0, 0)),         # position (shared)
                  pl.BlockSpec((1, S, 1), lambda b: (b, 0, 0)),   # token-type (0/1)
                  pl.BlockSpec((2, H), lambda b: (0, 0)),         # type table
                  pl.BlockSpec((1, H), lambda b: (0, 0)),
                  pl.BlockSpec((1, H), lambda b: (0, 0))],
        out_specs=pl.BlockSpec((1, S, H), lambda b: (b, 0, 0)),
        compiler_params=pltpu.CompilerParams(
            dimension_semantics=("parallel",),
            vmem_limit_bytes=_vmem_limit(_embed_vmem_estimate(S, H))),
    )(word_g, pos_e, tt_col, type_tab, gamma, beta)


def encoder_layer(x, amask, lp, num_heads):
    B, S, H = x.shape
    nH = num_heads
    dh = H // nH
    I = lp["w1"].shape[1]
    tq = _choose_q_tile(S)
    nQ = S // tq
    kern = functools.partial(layer_kernel, num_heads=nH)

    def const(shape):
        return pl.BlockSpec(shape, lambda b, q, _s=shape: (0,) * len(_s))

    in_specs = [
        pl.BlockSpec((1, tq, H), lambda b, q: (b, q, 0)),   # x (query tile)
        pl.BlockSpec((1, S, H), lambda b, q: (b, 0, 0)),    # x (full seq, for K/V)
        pl.BlockSpec((1, 1, S), lambda b, q: (b, 0, 0)),    # additive mask
        const((nH, H, dh)), const((nH, 1, dh)),             # Wq, bq (head-major)
        const((nH, H, dh)), const((nH, 1, dh)),             # Wk, bk
        const((nH, H, dh)), const((nH, 1, dh)),             # Wv, bv
        const((nH, dh, H)), const((1, H)),                  # Wo, bo
        const((1, H)), const((1, H)),                       # LN1 gamma/beta
        const((H, I)), const((1, I)),                       # W1, b1
        const((I, H)), const((1, H)),                       # W2, b2
        const((1, H)), const((1, H)),                       # LN2 gamma/beta
    ]
    grid_spec = pltpu.PrefetchScalarGridSpec(
        num_scalar_prefetch=0,
        grid=(B, nQ),
        in_specs=in_specs,
        out_specs=pl.BlockSpec((1, tq, H), lambda b, q: (b, q, 0)),
        scratch_shapes=[pltpu.VMEM((tq, H), jnp.float32)])
    return pl.pallas_call(
        kern,
        out_shape=jax.ShapeDtypeStruct((B, S, H), jnp.bfloat16),
        grid_spec=grid_spec,
        compiler_params=pltpu.CompilerParams(
            dimension_semantics=("parallel", "parallel"),
            vmem_limit_bytes=_vmem_limit(
                _layer_vmem_estimate(S, tq, H, I, nH, dh))),
    )(x, x, amask,
      lp["wq"], lp["bq"], lp["wk"], lp["bk"], lp["wv"], lp["bv"],
      lp["wo"], lp["bo"], lp["ln1_g"], lp["ln1_b"],
      lp["w1"], lp["b1"], lp["w2"], lp["b2"], lp["ln2_g"], lp["ln2_b"])


def classifier(cls_tok, w, b):
    B, H = cls_tok.shape
    Cp = w.shape[1]
    return pl.pallas_call(
        classifier_kernel,
        out_shape=jax.ShapeDtypeStruct((B, Cp), jnp.float32),
    )(cls_tok, w, b)


# ------------------------------- params & model -------------------------------

def _round_up(x, m):
    return (x + m - 1) // m * m


def init_bert_params(key, cfg):
    H, I = cfg["hidden"], cfg["intermediate"]
    nH = cfg["heads"]
    assert H % nH == 0
    dh = H // nH
    V, P, L, C = cfg["vocab"], cfg["max_pos"], cfg["layers"], cfg["num_classes"]
    Cp = _round_up(C, 128)  # lane-dense classifier output

    def dense(k, shape, dtype=jnp.bfloat16):
        return (0.02 * jax.random.normal(k, shape, jnp.float32)).astype(dtype)

    keys = jax.random.split(key, 4 + L)
    cls_w_full = jnp.zeros((H, Cp), jnp.float32).at[:, :C].set(
        0.02 * jax.random.normal(keys[3], (H, C), jnp.float32))
    params = {
        "word_emb": dense(keys[0], (V, H)),
        "pos_emb": dense(keys[1], (P, H)),
        "type_emb": dense(keys[2], (2, H)),
        "emb_ln_g": jnp.ones((1, H), jnp.float32),
        "emb_ln_b": jnp.zeros((1, H), jnp.float32),
        "cls_w": cls_w_full.astype(jnp.bfloat16),
        "cls_b": jnp.zeros((1, Cp), jnp.float32),
        "layers": [],
    }
    for l in range(L):
        lk = jax.random.split(keys[4 + l], 6)
        params["layers"].append({
            # Head-major projection weights: no head split/merge relayouts in-kernel.
            "wq": dense(lk[0], (nH, H, dh)), "bq": jnp.zeros((nH, 1, dh), jnp.float32),
            "wk": dense(lk[1], (nH, H, dh)), "bk": jnp.zeros((nH, 1, dh), jnp.float32),
            "wv": dense(lk[2], (nH, H, dh)), "bv": jnp.zeros((nH, 1, dh), jnp.float32),
            "wo": dense(lk[3], (nH, dh, H)), "bo": jnp.zeros((1, H), jnp.float32),
            "ln1_g": jnp.ones((1, H), jnp.float32),
            "ln1_b": jnp.zeros((1, H), jnp.float32),
            "w1": dense(lk[4], (H, I)), "b1": jnp.zeros((1, I), jnp.float32),
            "w2": dense(lk[5], (I, H)), "b2": jnp.zeros((1, H), jnp.float32),
            "ln2_g": jnp.ones((1, H), jnp.float32),
            "ln2_b": jnp.zeros((1, H), jnp.float32),
        })
    return params


def bert_forward(params, input_ids, attention_mask, token_type_ids, cfg):
    B, S = input_ids.shape
    # Word-embedding table row gather stays as XLA indexing glue; position row and
    # token-type select are handled inside the embedding kernel (no extra [B,S,H]
    # HBM tensors).
    word_g = params["word_emb"][input_ids]                       # [B, S, H] bf16
    pos_e = params["pos_emb"][:S]                                # [S, H]    bf16
    tt_col = token_type_ids.astype(jnp.float32).reshape(B, S, 1)
    hidden = embed_layernorm(word_g, pos_e, tt_col, params["type_emb"],
                             params["emb_ln_g"], params["emb_ln_b"])

    # Additive key mask computed ONCE, reused by every layer.
    amask = ((1.0 - attention_mask.astype(jnp.float32)) * (-1e9)).reshape(B, 1, S)

    for lp in params["layers"]:
        hidden = encoder_layer(hidden, amask, lp, cfg["heads"])

    cls_tok = hidden[:, 0, :]                                    # last_hidden_state[:, 0, :]
    logits = classifier(cls_tok, params["cls_w"], params["cls_b"])
    return logits[:, :cfg["num_classes"]]


# ------------------------------------ main ------------------------------------

if __name__ == "__main__":
    cfg = dict(vocab=100, hidden=64, heads=4, layers=2, intermediate=128,
               max_pos=32, num_classes=4)
    B, S = 2, 8

    key = jax.random.PRNGKey(0)
    pkey, dkey = jax.random.split(key)
    params = init_bert_params(pkey, cfg)

    input_ids = jax.random.randint(dkey, (B, S), 0, cfg["vocab"], dtype=jnp.int32)
    attention_mask = jnp.ones((B, S), jnp.float32).at[1, 6:].set(0.0)
    token_type_ids = jnp.zeros((B, S), jnp.int32)

    logits = bert_forward(params, input_ids, attention_mask, token_type_ids, cfg)
    logits = jax.block_until_ready(logits)
    assert logits.shape == (B, cfg["num_classes"])
    assert bool(jnp.all(jnp.isfinite(logits)))
    print("KERNEL_OK")
</pallas_src>

<mosaic_0001>
module attributes {stable_mosaic.version = 11 : i64} {
  func.func @embed_ln_kernel(%arg0: i32, %arg1: memref<1x8x64xbf16, #tpu.memory_space<vmem>>, %arg2: memref<8x64xbf16, #tpu.memory_space<vmem>>, %arg3: memref<1x8x1xf32, #tpu.memory_space<vmem>>, %arg4: memref<2x64xbf16, #tpu.memory_space<vmem>>, %arg5: memref<1x64xf32, #tpu.memory_space<vmem>>, %arg6: memref<1x64xf32, #tpu.memory_space<vmem>>, %arg7: memref<1x8x64xbf16, #tpu.memory_space<vmem>>) attributes {dimension_semantics = [#tpu.dimension_semantics<parallel>], iteration_bounds = array<i64: 2>, scalar_prefetch = 0 : i64, scratch_operands = 0 : i64, tpu.core_type = #tpu.core_type<tc>, window_params = [{transform_indices = @transform_0, window_bounds = array<i64: 1, 8, 64>}, {pipeline_mode = #tpu.pipeline_mode<synchronous>, transform_indices = @transform_1, window_bounds = array<i64: 8, 64>}, {transform_indices = @transform_2, window_bounds = array<i64: 1, 8, 1>}, {pipeline_mode = #tpu.pipeline_mode<synchronous>, transform_indices = @transform_3, window_bounds = array<i64: 2, 64>}, {pipeline_mode = #tpu.pipeline_mode<synchronous>, transform_indices = @transform_4, window_bounds = array<i64: 1, 64>}, {pipeline_mode = #tpu.pipeline_mode<synchronous>, transform_indices = @transform_5, window_bounds = array<i64: 1, 64>}, {transform_indices = @transform_6, window_bounds = array<i64: 1, 8, 64>}]} {
    %c0 = arith.constant 0 : index
    %c0_0 = arith.constant 0 : index
    %c0_1 = arith.constant 0 : index
    %0 = vector.load %arg1[%c0, %c0_0, %c0_1] : memref<1x8x64xbf16, #tpu.memory_space<vmem>>, vector<1x8x64xbf16>
    %1 = vector.shape_cast %0 : vector<1x8x64xbf16> to vector<8x64xbf16>
    %2 = arith.extf %1 : vector<8x64xbf16> to vector<8x64xf32>
    %c0_2 = arith.constant 0 : index
    %c0_3 = arith.constant 0 : index
    %3 = vector.load %arg2[%c0_2, %c0_3] : memref<8x64xbf16, #tpu.memory_space<vmem>>, vector<8x64xbf16>
    %4 = arith.extf %3 : vector<8x64xbf16> to vector<8x64xf32>
    %5 = arith.addf %2, %4 : vector<8x64xf32>
    %c0_4 = arith.constant 0 : index
    %c0_5 = arith.constant 0 : index
    %6 = vector.load %arg4[%c0_4, %c0_5] : memref<2x64xbf16, #tpu.memory_space<vmem>>, vector<2x64xbf16>
    %7 = arith.extf %6 : vector<2x64xbf16> to vector<2x64xf32>
    %8 = vector.extract_strided_slice %7 {offsets = [0, 0], sizes = [1, 64], strides = [1, 1]} : vector<2x64xf32> to vector<1x64xf32>
    %9 = vector.extract_strided_slice %7 {offsets = [1, 0], sizes = [1, 64], strides = [1, 1]} : vector<2x64xf32> to vector<1x64xf32>
    %c0_6 = arith.constant 0 : index
    %c0_7 = arith.constant 0 : index
    %c0_8 = arith.constant 0 : index
    %10 = vector.load %arg3[%c0_6, %c0_7, %c0_8] : memref<1x8x1xf32, #tpu.memory_space<vmem>>, vector<1x8x1xf32>
    %11 = vector.shape_cast %10 : vector<1x8x1xf32> to vector<8x1xf32>
    %12 = vector.broadcast %8 : vector<1x64xf32> to vector<8x64xf32>
    %13 = arith.addf %5, %12 : vector<8x64xf32>
    %14 = arith.subf %9, %8 : vector<1x64xf32>
    %15 = vector.broadcast %11 : vector<8x1xf32> to vector<8x64xf32>
    %16 = vector.broadcast %14 : vector<1x64xf32> to vector<8x64xf32>
    %17 = arith.mulf %15, %16 : vector<8x64xf32>
    %18 = arith.addf %13, %17 : vector<8x64xf32>
    %c0_9 = arith.constant 0 : index
    %c0_10 = arith.constant 0 : index
    %19 = vector.load %arg5[%c0_9, %c0_10] : memref<1x64xf32, #tpu.memory_space<vmem>>, vector<1x64xf32>
    %c0_11 = arith.constant 0 : index
    %c0_12 = arith.constant 0 : index
    %20 = vector.load %arg6[%c0_11, %c0_12] : memref<1x64xf32, #tpu.memory_space<vmem>>, vector<1x64xf32>
    %cst = arith.constant dense<0.000000e+00> : vector<8xf32>
    %21 = vector.multi_reduction <add>, %18, %cst [1] : vector<8x64xf32> to vector<8xf32>
    %22 = vector.shape_cast %21 : vector<8xf32> to vector<8x1xf32>
    %cst_13 = arith.constant 6.400000e+01 : f32
    %23 = vector.broadcast %cst_13 : f32 to vector<8x1xf32>
    %24 = arith.divf %22, %23 : vector<8x1xf32>
    %25 = vector.broadcast %24 : vector<8x1xf32> to vector<8x64xf32>
    %26 = arith.subf %18, %25 : vector<8x64xf32>
    %27 = arith.mulf %26, %26 : vector<8x64xf32>
    %cst_14 = arith.constant dense<0.000000e+00> : vector<8xf32>
    %28 = vector.multi_reduction <add>, %27, %cst_14 [1] : vector<8x64xf32> to vector<8xf32>
    %29 = vector.shape_cast %28 : vector<8xf32> to vector<8x1xf32>
    %cst_15 = arith.constant 6.400000e+01 : f32
    %30 = vector.broadcast %cst_15 : f32 to vector<8x1xf32>
    %31 = arith.divf %29, %30 : vector<8x1xf32>
    %32 = vector.broadcast %24 : vector<8x1xf32> to vector<8x64xf32>
    %33 = arith.subf %18, %32 : vector<8x64xf32>
    %cst_16 = arith.constant 9.99999996E-13 : f32
    %34 = vector.broadcast %cst_16 : f32 to vector<8x1xf32>
    %35 = arith.addf %31, %34 : vector<8x1xf32>
    %36 = math.rsqrt %35 : vector<8x1xf32>
    %37 = vector.broadcast %36 : vector<8x1xf32> to vector<8x64xf32>
    %38 = arith.mulf %33, %37 : vector<8x64xf32>
    %39 = vector.broadcast %19 : vector<1x64xf32> to vector<8x64xf32>
    %40 = arith.mulf %38, %39 : vector<8x64xf32>
    %41 = vector.broadcast %20 : vector<1x64xf32> to vector<8x64xf32>
    %42 = arith.addf %40, %41 : vector<8x64xf32>
    %43 = arith.truncf %42 : vector<8x64xf32> to vector<8x64xbf16>
    %c0_17 = arith.constant 0 : index
    %c0_18 = arith.constant 0 : index
    %c0_19 = arith.constant 0 : index
    %44 = vector.load %arg7[%c0_17, %c0_18, %c0_19] : memref<1x8x64xbf16, #tpu.memory_space<vmem>>, vector<1x8x64xbf16>
    %45 = vector.shape_cast %44 : vector<1x8x64xbf16> to vector<8x64xbf16>
    %46 = vector.shape_cast %43 : vector<8x64xbf16> to vector<1x8x64xbf16>
    tpu.vector_store %arg7[%c0_17, %c0_18, %c0_19], %46 {strides = array<i32>} : memref<1x8x64xbf16, #tpu.memory_space<vmem>>, vector<1x8x64xbf16>,
    return
  }
  func.func @transform_0(%arg0: i32) -> (i32, i32, i32) {
    %c0_i32 = arith.constant 0 : i32
    %c0_i32_0 = arith.constant 0 : i32
    %c0_i32_1 = arith.constant 0 : i32
    return %arg0, %c0_i32, %c0_i32_0 : i32, i32, i32
  }
  func.func @transform_1(%arg0: i32) -> (i32, i32) {
    %c0_i32 = arith.constant 0 : i32
    %c0_i32_0 = arith.constant 0 : i32
    %c0_i32_1 = arith.constant 0 : i32
    return %c0_i32, %c0_i32_0 : i32, i32
  }
  func.func @transform_2(%arg0: i32) -> (i32, i32, i32) {
    %c0_i32 = arith.constant 0 : i32
    %c0_i32_0 = arith.constant 0 : i32
    %c0_i32_1 = arith.constant 0 : i32
    return %arg0, %c0_i32, %c0_i32_0 : i32, i32, i32
  }
  func.func @transform_3(%arg0: i32) -> (i32, i32) {
    %c0_i32 = arith.constant 0 : i32
    %c0_i32_0 = arith.constant 0 : i32
    %c0_i32_1 = arith.constant 0 : i32
    return %c0_i32, %c0_i32_0 : i32, i32
  }
  func.func @transform_4(%arg0: i32) -> (i32, i32) {
    %c0_i32 = arith.constant 0 : i32
    %c0_i32_0 = arith.constant 0 : i32
    %c0_i32_1 = arith.constant 0 : i32
    return %c0_i32, %c0_i32_0 : i32, i32
  }
  func.func @transform_5(%arg0: i32) -> (i32, i32) {
    %c0_i32 = arith.constant 0 : i32
    %c0_i32_0 = arith.constant 0 : i32
    %c0_i32_1 = arith.constant 0 : i32
    return %c0_i32, %c0_i32_0 : i32, i32
  }
  func.func @transform_6(%arg0: i32) -> (i32, i32, i32) {
    %c0_i32 = arith.constant 0 : i32
    %c0_i32_0 = arith.constant 0 : i32
    %c0_i32_1 = arith.constant 0 : i32
    return %arg0, %c0_i32, %c0_i32_0 : i32, i32, i32
  }
}

</mosaic_0001>

<bundles_post_ra>
// kernel: tpu_custom_call.1
= control target key start
LH: loop header
LB: loop body
LE: loop exit
PB: predicated region body
PF: predicated region fallthrough
CT: control target
= control target key end

     0   :  { %11 = vsyncpa [#allocation3], 0  ;;  %s683_s0 = inlined_call_operand.vmem [shape: bf16[2,8,64], index: 0, kind: input, shape index: {}]   ;;  %s684_s1 = inlined_call_operand.vmem [shape: bf16[8,64], index: 1, kind: input, shape index: {}]   ;;  %s685_s2 = inlined_call_operand.vmem [shape: f32[2,8,1], index: 2, kind: input, shape index: {}]   ;;  %s686_s3 = inlined_call_operand.vmem [shape: bf16[2,64], index: 3, kind: input, shape index: {}]   ;;  %s687_s4 = inlined_call_operand.vmem [shape: f32[1,64], index: 4, kind: input, shape index: {}]   ;;  %s688_s5 = inlined_call_operand.vmem [shape: f32[1,64], index: 5, kind: input, shape index: {}]   ;;  %s689_s6 = inlined_call_operand.hbm [shape: bf16[2,8,64], index: 6, kind: output, shape index: {}]  }
   0x1   :  { %13 = vsyncpa [#allocation3 + $0x1], 0  ;;  %s568_s21 = smov 0   ;;  %s570_s22 = smov 0  }
   0x2   :  { %s572_s23 = smov 0   ;;  %s574_s24 = smov 0  }
   0x3 LB: > { %s589_s25 = sadd.s32 4294967295, %s529_s24   ;;  %s411_s26 = sadd.s32 4294967294, %s529_s24   ;;  %s529_s24 = sphi %s574_s24, %s695_s24   ;;  %s525_s23 = sphi %s572_s23, %s694_s23   ;;  %s521_s22 = sphi %s570_s22, %s693_s22   ;;  %s517_s21 = sphi %s568_s21, %s692_s21  }
   0x4   : > { %s593_s27 = sadd.s32 1, %s529_s24   ;;  %s162_s28 = sadd.s32 1, %s525_s23 }
   0x5   : > { %s159_s29 = ssub.s32 %s529_s24, %s593_s27  ;;  %p172_p0 = scmp.ne.s32.totalorder %s525_s23, %s521_s22 }
   0x6   : > { %p160_p1 = scmp.eq.s32.totalorder %s159_s29, 0  ;;  %p173_p2 = scmp.eq.s32.totalorder %s589_s25, 1 }
   0x7   : > { %p178_p3 = scmp.ne.s32.totalorder %s521_s22, %s517_s21  ;;  %p179_p4 = scmp.eq.s32.totalorder %s411_s26, 1 }
   0x8   : > { %s604_s30 = scalar_select %p160_p1, %s525_s23, %s162_s28  }
   0x9   : > { %p606_p5 = por %p173_p2, %p172_p0  ;;  %p610_p6 = por %p179_p4, %p178_p3 }
   0xa   : > { %p414_p7 = scmp.ge.s32.totalorder %s529_s24, 1  ;;  %p223_p8 = scmp.lt.s32.totalorder %s529_s24, 3 }
   0xc   : > { %p224_p9 = pnand %p414_p7, %p223_p8 }
   0xd   : > { %p256_p10 = scmp.lt.s32.totalorder (!%p224_p9), %s589_s25, 1  ;;  %v531_v0 = vmov (!%p224_p9), 0   ;;  %v269_v2 = vld [vmem:[%s686_s3] sm:$0x1] (!%p224_p9)  ;;  %v272_v3 = vlaneseq (!%p224_p9)  ;;  %vm294_vm0 = vcmask (!%p224_p9), 523264   ;;  %s253_s28 = sand.u32 (!%p224_p9), 1, %s521_s22  }
   0xe   : > { %227 = sbr.rel (%p224_p9) target bundleno = 487 (0x1e7), region = 44  ;;  %464 = vset.pattern.permute.xlu0 (!%p224_p9), %v531_v0  ;;  %v270_v4 = vunpack.c.l.bf16 (!%p224_p9), %v269_v2  ;;  %v266_v7 = vld [vmem:[%s684_s1] sm:$0xf] (!%p224_p9)  ;;  %s415_s29 = sshll.u32 (!%p224_p9), %s253_s28, 2  ;;  %vm324_vm1 = vcmask (!%p224_p9), 519168  }
   0xf   : > { %v273_v5 = vshrl.u32 (!%p224_p9), %v272_v3, 7  ;;  %v267_v10 = vunpack.c.l.bf16 (!%p224_p9), %v266_v7  ;;  %v418_v31 = vld [vmem:[%s687_s4] ss:$0 sm:$0xff] (!%p224_p9) }
  0x10   : > { %v278_v8 = vrot.slane (!%p224_p9), %v270_v4, 7  ;;  %v419_v33 = vld [vmem:[%s688_s5] ss:$0 sm:$0xff] (!%p224_p9) }
  0x11   : > { %v274_v11 = vsub.s32 (!%p224_p9), 0, %v273_v5  ;;  %v288_v13 = vsub.s32 (!%p224_p9), 1, %v273_v5 }
  0x12   : > { %v280_v12 = vsub.f32 (!%p224_p9), %v270_v4, %v278_v8 }
  0x13   : > { %v275_v15 = vrot.slane (!%p224_p9), %v270_v4, %v274_v11 }
  0x14   : > { %v289_v16 = vrot.slane (!%p224_p9), %v280_v12, %v288_v13 }
  0x15   : > { %s257_s9 = scalar_select %p256_p10, %s589_s25, 1 }
  0x17   : > { %s417_s10 = sshll.u32 %s257_s9, 3  ;;  %s416_s14 = sshll.u32 %s257_s9, 2 }
  0x18   : > { %s263_s13 = scalar_lea.vmem %s685_s2, %s417_s10  ;;  %s259_s19 = scalar_lea.vmem %s683_s0, %s416_s14 }
  0x19   : > { %v271_v1 = vld [vmem:[%s263_s13] sm:$0xff]  ;;  %s421_s13 = sshll.u32 %s589_s25, 6  ;;  %s255_s14 = scalar_lea.vmem [#allocation2], %s415_s29 }
  0x1a   : > { %283 = vperm.xlu0 %464, %v271_v1   ;;  %v264_v6 = vld [vmem:[%s259_s19] sm:$0xf]  ;;  %s340_s15 = sshll.u32 %s255_s14, 4  ;;  %s641_s18 = scalar_lea.hbm %s689_s6, %s421_s13  ;;  %s643_s15 = int_to_ptr.vmem [resolvable:$true] %s340_s15 }
  0x1b   : > { %v265_v9 = vunpack.c.l.bf16 %v264_v6  ;;  %s327_s19 = scalar_lea.sflag [#allocation3], %s253_s28  ;;  %s467_s20 = scalar_lea.vmem %s643_s15, 64 }
  0x1c   : > { %p468_p11 = scmp.ne.s32.totalorder %s643_s15, %s467_s20  ;;  %s532_s25 = smov [#allocation2]  }
  0x1d   : > { %v268_v14 = vadd.f32 %v267_v10, %v265_v9  ;;  %s471_s26 = sshll.u32 %s532_s25, 4  ;;  %s472_s26 = int_to_ptr.vmem [resolvable:$false] %s471_s26 }
  0x1e   : > { %p469_p12 = pnand %p468_p11, %p606_p5  ;;  %s473_s29 = scalar_lea.vmem %s472_s26, 128 }
  0x1f   : > { %v276_v17 = vadd.f32 %v275_v15, %v268_v14  ;;  %p474_p0 = scmp.lt.s32.totalorder %s643_s15, %s472_s26  ;;  %p475_p1 = scmp.lt.s32.totalorder %s473_s29, %s467_s20 }
  0x20   : > { %p470_p13 = pneg %p469_p12 }
  0x21   : > { %p476_p2 = por %p475_p1, %p474_p0 }
  0x23   : > { %p477_p3 = pnand %p476_p2, %p470_p13 }
  0x99   : > { %v284_v18 = vpop.permute.xlu0 %283 }
  0x9a   : > { %v290_v19 = vmul.f32 %v289_v16, %v284_v18 }
  0x9c   : > { %v291_v20 = vadd.f32 %v290_v19, %v276_v17 }
  0x9e   : > { %v295_v21 = vsel %vm294_vm0, %v291_v20, 0.0 }
  0x9f   : > { %296 = vadd.xlane.f32.xlu0 %v295_v21 }
 0x12c   : > { %v297_v22 = vpop.xlane.xlu0 %296 }
 0x12d   : > { %v299_v23 = vmul.f32 0.015625, %v297_v22 }
 0x12f   : > { %v300_v24 = vsub.f32 %v291_v20, %v299_v23 }
 0x131   : > { %v301_v25 = vmul.f32 %v300_v24, %v300_v24 }
 0x133   : > { %v302_v26 = vsel %vm294_vm0, %v301_v25, 0.0 }
 0x134   : > { %303 = vadd.xlane.f32.xlu1 %v302_v26 }
 0x1c1   : > { %v304_v27 = vpop.xlane.xlu1 %303 }
 0x1c2   : > { %v305_v28 = vmul.f32 0.015625, %v304_v27 }
 0x1c4   : > { %v306_v29 = vadd.f32 1e-12, %v305_v28 }
 0x1c6   : > { %465 = vrsqrt.f32 %v306_v29 }
 0x1d0   : > { %v466_v30 = vpop.eup %465 }
 0x1d1   : > { %v308_v32 = vmul.f32 %v466_v30, %v300_v24 }
 0x1d3   : > { %v315_v34 = vmul.f32 %v418_v31, %v308_v32 }
 0x1d5   : > { %v322_v35 = vadd.f32 %v419_v33, %v315_v34 }
 0x1d7   : > { %v323_v36 = vpack.c.bf16 %v322_v35, %v322_v35 }
 0x1d9   : > { %325 = vst.msk [vmem:[%s255_s14] sm:$0xf] %vm324_vm1, %v323_v36 }
 0x1da   : > { %480 = shalt.err (!%p477_p3)
}
 0x1db   : > { %s481_s28 = scalar_lea.hbm %s641_s18, 64  ;;  %s485_s11 = scalar_lea.hbm %s689_s6, 128 }
 0x1dc   : > { %p482_p4 = scmp.ne.s32.totalorder %s641_s18, %s481_s28  ;;  %p486_p9 = scmp.lt.u32.totalorder %s641_s18, %s689_s6 }
 0x1dd   : > { %p487_p10 = scmp.lt.u32.totalorder %s485_s11, %s481_s28  ;;  %p489_p12 = scmp.lt.u32.totalorder %s481_s28, %s641_s18 }
 0x1de   : > { %p483_p7 = pnand %p482_p4, %p606_p5 }
 0x1df   : > { %p488_p11 = por %p487_p10, %p486_p9 }
 0x1e0   : > { %p484_p8 = pneg %p483_p7 }
 0x1e1   : > { %p490_p13 = por %p489_p12, %p488_p11 }
 0x1e3   : > { %p491_p0 = pnand %p490_p13, %p484_p8 }
 0x1e5   : > { %494 = shalt.err (!%p491_p0)
}
 0x1e6   : > { %424 = dma.vmem_to_hbm [thread:$0]  (%p606_p5), %s643_s15, 64, %s641_s18, %s327_s19  }
 0x1e7 PF: > { %p430_p1 = scmp.ge.s32.totalorder %s529_s24, 2  ;;  %s352_s14 = sand.u32 1, %s517_s21  }
 0x1e8   : > { %s353_s16 = scalar_lea.sflag [#allocation3], %s352_s14 }
 0x1e9   : > { %p427_p2 = pnand %p430_p1, %p610_p6 }
 0x1eb   : > { %512 = dma.done.wait (!%p427_p2), %s353_s16, 64  }
 0x1ec   : > { %514 = vsyncadd (!%p427_p2), %s353_s16, 4294967232  ;;  %p16_p3 = scmp.ge.s32.totalorder %s593_s27, 4   ;;  %s692_s21 = smov %s521_s22 }
 0x1ed   : > { %s693_s22 = smov %s525_s23  ;;  %s694_s23 = smov %s604_s30 }
 0x1ee   : > { %s695_s24 = smov %s593_s27  ;;  %18 = sbr.rel (!%p16_p3) target bundleno = 3 (0x3), region = 82 }
 0x1f5   :  { %358 = vsyncpa [#allocation3], 1 }
 0x1f6   :  { %360 = vsyncpa [#allocation3 + $0x1], 1 }

</bundles_post_ra>
